<compile_context>
chip_gen: v7x
topology: tpu7x:2x2x1
jax: 0.10.0
libtpu: 0.0.40
codegen_flags: <defaults>
</compile_context>

<pallas_src>
import numpy as np
import jax
import jax.numpy as jnp
from jax.experimental import pallas as pl
from jax.experimental.pallas import tpu as pltpu


_TARGET_CONCURRENT_DMAS = 8   # enough in-flight copies to saturate HBM bandwidth
_MIN_LANE_CHUNK = 512         # elements; keep each DMA's per-row contiguous run large
_LANE_ALIGN = 128             # chunk boundaries on lane-tile multiples


def _split_lanes(length, max_chunks):
    """Static (start, size) lane chunks; boundaries are multiples of 128."""
    if max_chunks <= 1 or length <= _MIN_LANE_CHUNK:
        return [(0, length)]
    step = -(-length // max_chunks)                   # ceil(length / max_chunks)
    step = max(step, _MIN_LANE_CHUNK)
    step = -(-step // _LANE_ALIGN) * _LANE_ALIGN      # round up to a 128 multiple
    chunks, start = [], 0
    while start < length:
        size = min(step, length - start)
        chunks.append((start, size))
        start += size
    return chunks


def _make_cat_dma_kernel(num_inputs, copy_plan):
    """Kernel issuing one HBM->HBM DMA per (input, lane-chunk), then waiting on all."""

    def kernel(*refs):
        in_refs = refs[:num_inputs]
        o_ref = refs[num_inputs]
        sem = refs[num_inputs + 1]
        # Start every copy first (maximal DMA-engine concurrency), then wait.
        copies = []
        for sem_idx, (inp_idx, src_start, dst_start, size) in enumerate(copy_plan):
            cp = pltpu.make_async_copy(
                in_refs[inp_idx].at[:, pl.ds(src_start, size)],
                o_ref.at[:, pl.ds(dst_start, size)],
                sem.at[sem_idx],
            )
            cp.start()
            copies.append(cp)
        for cp in copies:
            cp.wait()

    return kernel


def cat_dim2(xs):
    """Pallas equivalent of torch.cat(xs, dim=2) for a list of (B, C, L_i) arrays."""
    xs = list(xs)
    if not xs:
        raise ValueError("cat_dim2 needs at least one input")
    if xs[0].ndim != 3:
        raise ValueError(f"expected rank-3 (B, C, L) inputs, got rank {xs[0].ndim}")
    B, C, _ = xs[0].shape
    dtype = xs[0].dtype
    for i, x in enumerate(xs):
        if x.ndim != 3 or x.shape[:2] != (B, C):
            raise ValueError(f"input {i}: leading dims {x.shape[:2]} != {(B, C)}")
        if x.dtype != dtype:
            raise ValueError(f"input {i}: dtype {x.dtype} != {dtype}")

    sizes = [int(x.shape[2]) for x in xs]
    offsets = np.cumsum([0] + sizes[:-1]).tolist()    # static lane offsets
    total = int(sum(sizes))
    rows = B * C
    itemsize = np.dtype(dtype).itemsize
    num_inputs = len(xs)

    # Collapse (B, C) -> rows (free, contiguous) so every DMA is a simple 2-D window.
    xs2 = [x.reshape(rows, s) for x, s in zip(xs, sizes)]

    # Static copy plan: (input index, src lane start, dst lane start, lane size).
    per_input = max(1, _TARGET_CONCURRENT_DMAS // num_inputs)
    copy_plan = []
    for i, (off, length) in enumerate(zip(offsets, sizes)):
        for c0, csz in _split_lanes(length, per_input):
            copy_plan.append((i, c0, off + c0, csz))

    out2 = pl.pallas_call(
        _make_cat_dma_kernel(num_inputs, copy_plan),
        out_shape=jax.ShapeDtypeStruct((rows, total), dtype),
        # Raw HBM refs on both sides: no auto-pipelined VMEM staging at all.
        in_specs=[pl.BlockSpec(memory_space=pl.ANY)] * num_inputs,
        out_specs=pl.BlockSpec(memory_space=pl.ANY),
        scratch_shapes=[pltpu.SemaphoreType.DMA((len(copy_plan),))],
        # Pure-bandwidth op: read + write of the full concatenated activation.
        cost_estimate=pl.CostEstimate(
            flops=0,
            transcendentals=0,
            bytes_accessed=2 * rows * total * itemsize,
        ),
    )(*xs2)

    return out2.reshape(B, C, total)


if __name__ == "__main__":
    # Case 1: small shapes consistent with the module's use in LowMemConv.
    B, C = 2, 4
    k0, k1, k2 = jax.random.split(jax.random.PRNGKey(0), 3)
    xs = [
        jax.random.normal(k0, (B, C, 128), dtype=jnp.float32),
        jax.random.normal(k1, (B, C, 256), dtype=jnp.float32),
        jax.random.normal(k2, (B, C, 128), dtype=jnp.float32),
    ]
    out = jax.block_until_ready(cat_dim2(xs))
    ref = jnp.concatenate(xs, axis=2)
    assert out.shape == ref.shape and out.dtype == ref.dtype
    np.testing.assert_array_equal(np.asarray(out), np.asarray(ref))

    # Case 2: bf16 path (dtype preserved end-to-end, no upcast inside the kernel).
    k3, k4 = jax.random.split(jax.random.PRNGKey(1), 2)
    ys = [
        jax.random.normal(k3, (2, 16, 256), dtype=jnp.bfloat16),
        jax.random.normal(k4, (2, 16, 128), dtype=jnp.bfloat16),
    ]
    out_y = jax.block_until_ready(cat_dim2(ys))
    ref_y = jnp.concatenate(ys, axis=2)
    assert out_y.shape == ref_y.shape and out_y.dtype == ref_y.dtype
    np.testing.assert_array_equal(
        np.asarray(out_y, dtype=np.float32), np.asarray(ref_y, dtype=np.float32)
    )

    # Case 3: odd B*C (rows not a multiple of 8) and lane chunking (>1 DMA per input).
    k5, k6 = jax.random.split(jax.random.PRNGKey(2), 2)
    zs = [
        jax.random.normal(k5, (1, 3, 1024), dtype=jnp.float32),
        jax.random.normal(k6, (1, 3, 640), dtype=jnp.float32),
    ]
    out_z = jax.block_until_ready(cat_dim2(zs))
    ref_z = jnp.concatenate(zs, axis=2)
    assert out_z.shape == ref_z.shape and out_z.dtype == ref_z.dtype
    np.testing.assert_array_equal(np.asarray(out_z), np.asarray(ref_z))

    print("KERNEL_OK")
</pallas_src>

<mosaic_0001>
module attributes {stable_mosaic.version = 11 : i64} {
  func.func @kernel(%arg0: memref<8x128xf32, #tpu.memory_space<any>>, %arg1: memref<8x256xf32, #tpu.memory_space<any>>, %arg2: memref<8x128xf32, #tpu.memory_space<any>>, %arg3: memref<8x512xf32, #tpu.memory_space<any>>, %arg4: memref<3x!tpu.dma_semaphore, #tpu.memory_space<semaphore_mem>>) attributes {dimension_semantics = [], scalar_prefetch = 0 : i64, scratch_operands = 1 : i64, tpu.core_type = #tpu.core_type<tc>} {
    %c0_i32 = arith.constant 0 : i32
    %c0_i32_0 = arith.constant 0 : i32
    %c0_i32_1 = arith.constant 0 : i32
    %0 = tpu.memref_slice %arg0[%c0_i32_0, %c0_i32_1] : memref<8x128xf32, #tpu.memory_space<any>> -> memref<8x128xf32, #tpu.memory_space<any>>
    %c0_i32_2 = arith.constant 0 : i32
    %c0_i32_3 = arith.constant 0 : i32
    %1 = tpu.memref_slice %arg3[%c0_i32_2, %c0_i32_3] : memref<8x512xf32, #tpu.memory_space<any>> -> memref<8x128xf32, #tpu.memory_space<any>>
    %2 = tpu.memref_slice %arg4[%c0_i32] : memref<3x!tpu.dma_semaphore, #tpu.memory_space<semaphore_mem>> -> memref<1x!tpu.dma_semaphore, #tpu.memory_space<semaphore_mem>>
    %3 = tpu.memref_squeeze %2 : memref<1x!tpu.dma_semaphore, #tpu.memory_space<semaphore_mem>> -> memref<!tpu.dma_semaphore, #tpu.memory_space<semaphore_mem>>
    tpu.enqueue_dma source(%0 : memref<8x128xf32, #tpu.memory_space<any>>) target(%1 : memref<8x128xf32, #tpu.memory_space<any>>) target_semaphore(%3 : memref<!tpu.dma_semaphore, #tpu.memory_space<semaphore_mem>>)
    %c1_i32 = arith.constant 1 : i32
    %c0_i32_4 = arith.constant 0 : i32
    %c0_i32_5 = arith.constant 0 : i32
    %4 = tpu.memref_slice %arg1[%c0_i32_4, %c0_i32_5] : memref<8x256xf32, #tpu.memory_space<any>> -> memref<8x256xf32, #tpu.memory_space<any>>
    %c0_i32_6 = arith.constant 0 : i32
    %c128_i32 = arith.constant 128 : i32
    %5 = tpu.memref_slice %arg3[%c0_i32_6, %c128_i32] : memref<8x512xf32, #tpu.memory_space<any>> -> memref<8x256xf32, #tpu.memory_space<any>>
    %6 = tpu.memref_slice %arg4[%c1_i32] : memref<3x!tpu.dma_semaphore, #tpu.memory_space<semaphore_mem>> -> memref<1x!tpu.dma_semaphore, #tpu.memory_space<semaphore_mem>>
    %7 = tpu.memref_squeeze %6 : memref<1x!tpu.dma_semaphore, #tpu.memory_space<semaphore_mem>> -> memref<!tpu.dma_semaphore, #tpu.memory_space<semaphore_mem>>
    tpu.enqueue_dma source(%4 : memref<8x256xf32, #tpu.memory_space<any>>) target(%5 : memref<8x256xf32, #tpu.memory_space<any>>) target_semaphore(%7 : memref<!tpu.dma_semaphore, #tpu.memory_space<semaphore_mem>>)
    %c2_i32 = arith.constant 2 : i32
    %c0_i32_7 = arith.constant 0 : i32
    %c0_i32_8 = arith.constant 0 : i32
    %8 = tpu.memref_slice %arg2[%c0_i32_7, %c0_i32_8] : memref<8x128xf32, #tpu.memory_space<any>> -> memref<8x128xf32, #tpu.memory_space<any>>
    %c0_i32_9 = arith.constant 0 : i32
    %c384_i32 = arith.constant 384 : i32
    %9 = tpu.memref_slice %arg3[%c0_i32_9, %c384_i32] : memref<8x512xf32, #tpu.memory_space<any>> -> memref<8x128xf32, #tpu.memory_space<any>>
    %10 = tpu.memref_slice %arg4[%c2_i32] : memref<3x!tpu.dma_semaphore, #tpu.memory_space<semaphore_mem>> -> memref<1x!tpu.dma_semaphore, #tpu.memory_space<semaphore_mem>>
    %11 = tpu.memref_squeeze %10 : memref<1x!tpu.dma_semaphore, #tpu.memory_space<semaphore_mem>> -> memref<!tpu.dma_semaphore, #tpu.memory_space<semaphore_mem>>
    tpu.enqueue_dma source(%8 : memref<8x128xf32, #tpu.memory_space<any>>) target(%9 : memref<8x128xf32, #tpu.memory_space<any>>) target_semaphore(%11 : memref<!tpu.dma_semaphore, #tpu.memory_space<semaphore_mem>>)
    %c0_i32_10 = arith.constant 0 : i32
    %c0_i32_11 = arith.constant 0 : i32
    %c0_i32_12 = arith.constant 0 : i32
    %12 = tpu.memref_slice %arg0[%c0_i32_11, %c0_i32_12] : memref<8x128xf32, #tpu.memory_space<any>> -> memref<8x128xf32, #tpu.memory_space<any>>
    %c0_i32_13 = arith.constant 0 : i32
    %c0_i32_14 = arith.constant 0 : i32
    %13 = tpu.memref_slice %arg3[%c0_i32_13, %c0_i32_14] : memref<8x512xf32, #tpu.memory_space<any>> -> memref<8x128xf32, #tpu.memory_space<any>>
    %14 = tpu.memref_slice %arg4[%c0_i32_10] : memref<3x!tpu.dma_semaphore, #tpu.memory_space<semaphore_mem>> -> memref<1x!tpu.dma_semaphore, #tpu.memory_space<semaphore_mem>>
    %15 = tpu.memref_squeeze %14 : memref<1x!tpu.dma_semaphore, #tpu.memory_space<semaphore_mem>> -> memref<!tpu.dma_semaphore, #tpu.memory_space<semaphore_mem>>
    tpu.wait_dma2 semaphore(%15 : memref<!tpu.dma_semaphore, #tpu.memory_space<semaphore_mem>>) src(%12 : memref<8x128xf32, #tpu.memory_space<any>>) dst(%13 : memref<8x128xf32, #tpu.memory_space<any>>)
    %c1_i32_15 = arith.constant 1 : i32
    %c0_i32_16 = arith.constant 0 : i32
    %c0_i32_17 = arith.constant 0 : i32
    %16 = tpu.memref_slice %arg1[%c0_i32_16, %c0_i32_17] : memref<8x256xf32, #tpu.memory_space<any>> -> memref<8x256xf32, #tpu.memory_space<any>>
    %c0_i32_18 = arith.constant 0 : i32
    %c128_i32_19 = arith.constant 128 : i32
    %17 = tpu.memref_slice %arg3[%c0_i32_18, %c128_i32_19] : memref<8x512xf32, #tpu.memory_space<any>> -> memref<8x256xf32, #tpu.memory_space<any>>
    %18 = tpu.memref_slice %arg4[%c1_i32_15] : memref<3x!tpu.dma_semaphore, #tpu.memory_space<semaphore_mem>> -> memref<1x!tpu.dma_semaphore, #tpu.memory_space<semaphore_mem>>
    %19 = tpu.memref_squeeze %18 : memref<1x!tpu.dma_semaphore, #tpu.memory_space<semaphore_mem>> -> memref<!tpu.dma_semaphore, #tpu.memory_space<semaphore_mem>>
    tpu.wait_dma2 semaphore(%19 : memref<!tpu.dma_semaphore, #tpu.memory_space<semaphore_mem>>) src(%16 : memref<8x256xf32, #tpu.memory_space<any>>) dst(%17 : memref<8x256xf32, #tpu.memory_space<any>>)
    %c2_i32_20 = arith.constant 2 : i32
    %c0_i32_21 = arith.constant 0 : i32
    %c0_i32_22 = arith.constant 0 : i32
    %20 = tpu.memref_slice %arg2[%c0_i32_21, %c0_i32_22] : memref<8x128xf32, #tpu.memory_space<any>> -> memref<8x128xf32, #tpu.memory_space<any>>
    %c0_i32_23 = arith.constant 0 : i32
    %c384_i32_24 = arith.constant 384 : i32
    %21 = tpu.memref_slice %arg3[%c0_i32_23, %c384_i32_24] : memref<8x512xf32, #tpu.memory_space<any>> -> memref<8x128xf32, #tpu.memory_space<any>>
    %22 = tpu.memref_slice %arg4[%c2_i32_20] : memref<3x!tpu.dma_semaphore, #tpu.memory_space<semaphore_mem>> -> memref<1x!tpu.dma_semaphore, #tpu.memory_space<semaphore_mem>>
    %23 = tpu.memref_squeeze %22 : memref<1x!tpu.dma_semaphore, #tpu.memory_space<semaphore_mem>> -> memref<!tpu.dma_semaphore, #tpu.memory_space<semaphore_mem>>
    tpu.wait_dma2 semaphore(%23 : memref<!tpu.dma_semaphore, #tpu.memory_space<semaphore_mem>>) src(%20 : memref<8x128xf32, #tpu.memory_space<any>>) dst(%21 : memref<8x128xf32, #tpu.memory_space<any>>)
    return
  }
}

</mosaic_0001>

<bundles_post_ra>
// kernel: tpu_custom_call.1
= control target key start
LH: loop header
LB: loop body
LE: loop exit
PB: predicated region body
PF: predicated region fallthrough
CT: control target
= control target key end

     0   :  { %s96_s15 = smov [#allocation2]   ;;  %s97_s16 = smov [#allocation3]   ;;  %s141_s0 = inlined_call_operand.hbm [shape: f32[8,128], index: 0, kind: input, shape index: {}]   ;;  %s142_s3 = inlined_call_operand.hbm [shape: f32[8,512], index: 3, kind: output, shape index: {}]   ;;  %s143_s1 = inlined_call_operand.hbm [shape: f32[8,256], index: 1, kind: input, shape index: {}]   ;;  %s144_s2 = inlined_call_operand.hbm [shape: f32[8,128], index: 2, kind: input, shape index: {}]  }
   0x1   :  { %s21_s14 = scalar_lea.hbm %s142_s3, 128  ;;  %s98_s17 = smov 0  }
   0x2   :  { %20 = dma.general %s141_s0, 128, %s142_s3, %s96_s15, %s97_s16, [#allocation4], %s98_s17, 0  }
   0x3   :  { %s36_s24 = scalar_lea.hbm %s142_s3, 384  ;;  %s99_s25 = smov [#allocation2 + $0x1]  }
   0x4   :  { %s100_s26 = smov [#allocation5]   ;;  %s101_s29 = smov [#allocation2 + $0x2]  }
   0x5   :  { %35 = dma.general %s143_s1, 256, %s21_s14, %s99_s25, %s100_s26, [#allocation6], %s98_s17, 0  }
   0x6   :  { %s102_s30 = smov [#allocation7]  }
   0x7   :  { %50 = dma.general %s144_s2, 128, %s36_s24, %s101_s29, %s102_s30, [#allocation8], %s98_s17, 0  }
   0x8   :  { %90 = dma.done.wait [#allocation2], 128 }
   0x9   :  { %91 = vsyncadd [#allocation2], 4294967168 }
   0xa   :  { %92 = dma.done.wait [#allocation2 + $0x1], 256 }
   0xb   :  { %93 = vsyncadd [#allocation2 + $0x1], 4294967040 }
   0xc   :  { %94 = dma.done.wait [#allocation2 + $0x2], 128 }
   0xd   :  { %95 = vsyncadd [#allocation2 + $0x2], 4294967168 }
   0xe   :  { %60 = vsyncmov [#allocation2] }
  0x11   :  { %s61_s0 = vpop.sfrf %60 }
  0x12   :  { %p80_p0 = scmp.ne.s32.totalorder %s61_s0, 0 }
  0x14   :  { %65 = shalt.err (%p80_p0)  }
  0x15   :  { %67 = vsyncmov [#allocation2 + $0x1] }
  0x18   :  { %s68_s3 = vpop.sfrf %67 }
  0x19   :  { %p81_p1 = scmp.ne.s32.totalorder %s68_s3, 0 }
  0x1b   :  { %72 = shalt.err (%p81_p1)  }
  0x1c   :  { %74 = vsyncmov [#allocation2 + $0x2] }
  0x1f   :  { %s75_s1 = vpop.sfrf %74 }
  0x20   :  { %p82_p2 = scmp.ne.s32.totalorder %s75_s1, 0 }
  0x22   :  { %79 = shalt.err (%p82_p2)  }

</bundles_post_ra>
